<compile_context>
chip_gen: v6e
topology: v6e:2x2x1
jax: 0.10.0
libtpu: 0.0.40
codegen_flags: <defaults>
</compile_context>

<pallas_src>
import functools
import math

import jax
import jax.numpy as jnp
from jax import lax
from jax.experimental import pallas as pl
from jax.experimental.pallas import tpu as pltpu


def _ceil_to(x: int, m: int) -> int:
    return ((x + m - 1) // m) * m


def _gcn_kernel(x_ref, a_ref, diag_ref, wt_ref, b_ref, o_ref,
                rowsum_ref, lin_ref, *, nk, tk, tail_valid, ragged):
    """One (row-tile i, A-column-chunk k) grid step.

    x_ref    : (tm, in_dim)       f32   resident across the column axis
    a_ref    : (tm, tk)           f32/bf16  streamed chunk of A (unpadded)
    diag_ref : (tm, 1)            f32   diag(A) for this row tile
    wt_ref   : (in_dim, out_pad)  f32   resident
    b_ref    : (1, out_pad)       f32   resident
    o_ref    : (tm, out_pad)      f32   written on the last column step only
    rowsum_ref : (tm, 128) f32 scratch  row-sum accumulator (all lanes equal)
    lin_ref    : (tm, out_pad) f32 scratch  x @ W^T + b
    """
    k = pl.program_id(1)

    @pl.when(k == 0)
    def _():
        rowsum_ref[...] = jnp.zeros_like(rowsum_ref)
        # Hoisted linear: overlaps with the remaining A-chunk DMAs of this row
        # tile instead of serializing on the final column step.
        lin_ref[...] = (
            jnp.dot(x_ref[...], wt_ref[...], preferred_element_type=jnp.float32)
            + b_ref[...])

    # Row-sum on the (otherwise idle) MXU: a_blk @ ones -> frees VALU/XLU and
    # avoids an explicit bf16->f32 upcast (f32 accumulation is exact for a
    # 0/1 adjacency in any streamed dtype).
    ones = jnp.ones((tk, 128), dtype=a_ref.dtype)

    def _accum(blk):
        rowsum_ref[...] += jnp.dot(blk, ones, preferred_element_type=jnp.float32)

    if ragged:
        # A is unpadded, so only the tail column chunk contains out-of-bounds
        # (unspecified) columns; mask them there and keep every other chunk
        # completely mask-free (no per-chunk iota/select on the hot path).
        @pl.when(k < nk - 1)
        def _():
            _accum(a_ref[...])

        @pl.when(k == nk - 1)
        def _():
            blk = a_ref[...]
            cols = lax.broadcasted_iota(jnp.int32, blk.shape, 1)
            _accum(jnp.where(cols < tail_valid, blk, jnp.zeros_like(blk)))
    else:
        _accum(a_ref[...])

    @pl.when(k == nk - 1)
    def _():
        # a_hat is diagonal:  a_hat[i,i] = (1 + A[i,i]) / (1 + sum_j A[i,j]).
        d_tilde = 1.0 + rowsum_ref[:, 0:1]          # (tm, 1)
        a_ii = 1.0 + diag_ref[...]                  # (tm, 1)
        # approx=True would route the divide onto the idle EUP slot; exact is
        # kept ((tm,1) once per row tile, negligible) so the 1e-5 check holds.
        scale = a_ii * pl.reciprocal(d_tilde, approx=False)
        o_ref[...] = scale * lin_ref[...]


def gcn_layer(x, a, w, b, *, tm=1024, tk=2048):
    """x: (N, in_dim), a: (N, N), w: (out_dim, in_dim), b: (out_dim,) -> (N, out_dim).

    A is streamed in its native dtype (f32 or bf16; bf16 is exact for 0/1
    adjacencies and halves the dominant HBM traffic).
    """
    n, in_dim = x.shape
    out_dim = w.shape[0]

    if a.dtype not in (jnp.float32, jnp.bfloat16):
        a = a.astype(jnp.float32)

    # Sublane packing of A's dtype sets the row-tile alignment (8 f32, 16 bf16).
    row_align = 8 * (4 // a.dtype.itemsize)

    # Round user tile sizes to legal (sublane, lane) multiples; keep >=2 row
    # tiles when possible so the "parallel" axis can shard across the two v7x
    # TensorCores.  Default (1024, 2048) keeps double-buffered f32 A chunks at
    # ~16 MiB, inside v7x's 32 MiB default scoped VMEM.
    tm = _ceil_to(max(1, min(tm, max(row_align, pl.cdiv(n, 2)))), row_align)
    tk = _ceil_to(max(1, min(tk, n)), 128)

    n_row_tiles = pl.cdiv(n, tm)
    n_rows_pad = n_row_tiles * tm
    nk = pl.cdiv(n, tk)
    ragged = (n % tk) != 0
    tail_valid = n - (nk - 1) * tk
    out_pad = _ceil_to(out_dim, 128)               # lane-dense output stores

    # A itself is NOT padded/cast (no extra HBM pass over N^2 data).  Only the
    # small per-node / per-feature arrays are padded; padded rows get a finite
    # scale and are sliced off below.
    xf = jnp.pad(x.astype(jnp.float32), ((0, n_rows_pad - n), (0, 0)))
    diag = jnp.pad(jnp.diagonal(a).astype(jnp.float32),
                   (0, n_rows_pad - n)).reshape(n_rows_pad, 1)
    wt = jnp.pad(w.T.astype(jnp.float32), ((0, 0), (0, out_pad - out_dim)))
    b2 = jnp.pad(b.astype(jnp.float32).reshape(1, out_dim),
                 ((0, 0), (0, out_pad - out_dim)))

    kernel = functools.partial(_gcn_kernel, nk=nk, tk=tk,
                               tail_valid=tail_valid, ragged=ragged)

    out = pl.pallas_call(
        kernel,
        out_shape=jax.ShapeDtypeStruct((n_rows_pad, out_pad), jnp.float32),
        grid_spec=pltpu.PrefetchScalarGridSpec(
            num_scalar_prefetch=0,
            grid=(n_row_tiles, nk),                # reduction (A columns) last
            in_specs=[
                pl.BlockSpec((tm, in_dim), lambda i, k: (i, 0)),       # x
                pl.BlockSpec((tm, tk), lambda i, k: (i, k)),           # A stream
                pl.BlockSpec((tm, 1), lambda i, k: (i, 0)),            # diag(A)
                pl.BlockSpec((in_dim, out_pad), lambda i, k: (0, 0)),  # W^T
                pl.BlockSpec((1, out_pad), lambda i, k: (0, 0)),       # b
            ],
            out_specs=pl.BlockSpec((tm, out_pad), lambda i, k: (i, 0)),
            scratch_shapes=[pltpu.VMEM((tm, 128), jnp.float32),        # row-sum
                            pltpu.VMEM((tm, out_pad), jnp.float32)],   # x@W^T+b
        ),
        compiler_params=pltpu.CompilerParams(
            dimension_semantics=("parallel", "arbitrary")),
    )(xf, a, diag, wt, b2)

    return out[:n, :out_dim]


def gcn_layer_ref(x, a, w, b):
    """Pure-JAX reference with identical (literal) torch semantics."""
    n = a.shape[0]
    eye = jnp.eye(n, dtype=jnp.float32)
    a_tilde = eye + a.astype(jnp.float32)
    d_tilde = a_tilde.sum(-1, keepdims=True)
    d_mat = eye * (d_tilde ** -0.5)
    a_hat = d_mat * a_tilde * d_mat                 # elementwise => diagonal
    return a_hat @ (x @ w.T + b)


if __name__ == "__main__":
    key = jax.random.PRNGKey(0)
    ok = True

    # (n, in_dim, out_dim, tm, tk, A dtype)
    #  - tiny case: single tile, ragged single column chunk, f32 A
    #  - larger case: (4, 2) grid, ragged tail chunk, bf16 A streaming,
    #    cross-chunk row-sum accumulation, padded rows/out_dim
    cases = [
        (8, 16, 32, 1024, 2048, jnp.float32),
        (200, 16, 32, 64, 128, jnp.bfloat16),
    ]

    for (n, in_dim, out_dim, tile_m, tile_k, a_dtype) in cases:
        kx, ka, kw, kb, key = jax.random.split(key, 5)

        x = jax.random.normal(kx, (n, in_dim), dtype=jnp.float32)

        # Symmetric 0/1 adjacency with zero diagonal (exactly representable in bf16).
        raw = (jax.random.uniform(ka, (n, n)) < 0.3).astype(jnp.float32)
        a = jnp.maximum(raw, raw.T) * (1.0 - jnp.eye(n, dtype=jnp.float32))
        a = a.astype(a_dtype)

        # nn.Linear(in_dim, out_dim) init: U(-1/sqrt(in_dim), 1/sqrt(in_dim)).
        bound = 1.0 / math.sqrt(in_dim)
        w = jax.random.uniform(kw, (out_dim, in_dim), minval=-bound,
                               maxval=bound, dtype=jnp.float32)
        b = jax.random.uniform(kb, (out_dim,), minval=-bound, maxval=bound,
                               dtype=jnp.float32)

        out = jax.block_until_ready(gcn_layer(x, a, w, b, tm=tile_m, tk=tile_k))
        ref = gcn_layer_ref(x, a, w, b)

        ok = ok and (out.shape == (n, out_dim))
        ok = ok and bool(jnp.allclose(out, ref, atol=1e-5, rtol=1e-5))

    assert ok
    print("KERNEL_OK")
</pallas_src>

<mosaic_0001>
module attributes {stable_mosaic.version = 11 : i64} {
  func.func @_gcn_kernel(%arg0: i32, %arg1: i32, %arg2: memref<8x16xf32, #tpu.memory_space<vmem>>, %arg3: memref<8x128xf32, #tpu.memory_space<vmem>>, %arg4: memref<8x1xf32, #tpu.memory_space<vmem>>, %arg5: memref<16x128xf32, #tpu.memory_space<vmem>>, %arg6: memref<1x128xf32, #tpu.memory_space<vmem>>, %arg7: memref<8x128xf32, #tpu.memory_space<vmem>>, %arg8: memref<8x128xf32, #tpu.memory_space<vmem>>, %arg9: memref<8x128xf32, #tpu.memory_space<vmem>>) attributes {dimension_semantics = [#tpu.dimension_semantics<parallel>, #tpu.dimension_semantics<arbitrary>], iteration_bounds = array<i64: 1, 1>, scalar_prefetch = 0 : i64, scratch_operands = 2 : i64, tpu.core_type = #tpu.core_type<tc>, window_params = [{transform_indices = @transform_0, window_bounds = array<i64: 8, 16>}, {transform_indices = @transform_1, window_bounds = array<i64: 8, 128>}, {transform_indices = @transform_2, window_bounds = array<i64: 8, 1>}, {pipeline_mode = #tpu.pipeline_mode<synchronous>, transform_indices = @transform_3, window_bounds = array<i64: 16, 128>}, {pipeline_mode = #tpu.pipeline_mode<synchronous>, transform_indices = @transform_4, window_bounds = array<i64: 1, 128>}, {transform_indices = @transform_5, window_bounds = array<i64: 8, 128>}]} {
    %c0_i32 = arith.constant 0 : i32
    %0 = arith.cmpi eq, %arg1, %c0_i32 : i32
    %1 = arith.extui %0 : i1 to i32
    %c0_i32_0 = arith.constant 0 : i32
    %2 = arith.cmpi ne, %1, %c0_i32_0 : i32
    scf.if %2 {
      %cst_7 = arith.constant 0.000000e+00 : f32
      %13 = vector.broadcast %cst_7 : f32 to vector<8x128xf32>
      %c0 = arith.constant 0 : index
      %c0_8 = arith.constant 0 : index
      %14 = vector.load %arg8[%c0, %c0_8] : memref<8x128xf32, #tpu.memory_space<vmem>>, vector<8x128xf32>
      tpu.vector_store %arg8[%c0, %c0_8], %13 {strides = array<i32>} : memref<8x128xf32, #tpu.memory_space<vmem>>, vector<8x128xf32>,
      %c0_9 = arith.constant 0 : index
      %c0_10 = arith.constant 0 : index
      %15 = vector.load %arg2[%c0_9, %c0_10] : memref<8x16xf32, #tpu.memory_space<vmem>>, vector<8x16xf32>
      %c0_11 = arith.constant 0 : index
      %c0_12 = arith.constant 0 : index
      %16 = vector.load %arg5[%c0_11, %c0_12] : memref<16x128xf32, #tpu.memory_space<vmem>>, vector<16x128xf32>
      %cst_13 = arith.constant dense<0.000000e+00> : vector<8x128xf32>
      %17 = tpu.matmul %15, %16, %cst_13 {dimension_numbers = #tpu.dot_dimension_numbers<[1], [0], [0], [1], [0, 0, 1, 1], [], []>} : vector<8x16xf32>, vector<16x128xf32>, vector<8x128xf32> -> vector<8x128xf32>
      %c0_14 = arith.constant 0 : index
      %c0_15 = arith.constant 0 : index
      %18 = vector.load %arg6[%c0_14, %c0_15] : memref<1x128xf32, #tpu.memory_space<vmem>>, vector<1x128xf32>
      %19 = vector.broadcast %18 : vector<1x128xf32> to vector<8x128xf32>
      %20 = arith.addf %17, %19 : vector<8x128xf32>
      %c0_16 = arith.constant 0 : index
      %c0_17 = arith.constant 0 : index
      %21 = vector.load %arg9[%c0_16, %c0_17] : memref<8x128xf32, #tpu.memory_space<vmem>>, vector<8x128xf32>
      tpu.vector_store %arg9[%c0_16, %c0_17], %20 {strides = array<i32>} : memref<8x128xf32, #tpu.memory_space<vmem>>, vector<8x128xf32>,
    } else {
    }
    %cst = arith.constant 1.000000e+00 : f32
    %3 = vector.broadcast %cst : f32 to vector<128x128xf32>
    %c0_i32_1 = arith.constant 0 : i32
    %4 = arith.cmpi slt, %arg1, %c0_i32_1 : i32
    %5 = arith.extui %4 : i1 to i32
    %c0_i32_2 = arith.constant 0 : i32
    %6 = arith.cmpi ne, %5, %c0_i32_2 : i32
    scf.if %6 {
      %c0 = arith.constant 0 : index
      %c0_7 = arith.constant 0 : index
      %13 = vector.load %arg3[%c0, %c0_7] : memref<8x128xf32, #tpu.memory_space<vmem>>, vector<8x128xf32>
      %c0_8 = arith.constant 0 : index
      %c0_9 = arith.constant 0 : index
      %14 = vector.load %arg8[%c0_8, %c0_9] : memref<8x128xf32, #tpu.memory_space<vmem>>, vector<8x128xf32>
      %cst_10 = arith.constant dense<0.000000e+00> : vector<8x128xf32>
      %15 = tpu.matmul %13, %3, %cst_10 {dimension_numbers = #tpu.dot_dimension_numbers<[1], [0], [0], [1], [0, 0, 1, 1], [], []>} : vector<8x128xf32>, vector<128x128xf32>, vector<8x128xf32> -> vector<8x128xf32>
      %16 = arith.addf %14, %15 : vector<8x128xf32>
      %c0_11 = arith.constant 0 : index
      %c0_12 = arith.constant 0 : index
      %17 = vector.load %arg8[%c0_11, %c0_12] : memref<8x128xf32, #tpu.memory_space<vmem>>, vector<8x128xf32>
      tpu.vector_store %arg8[%c0_11, %c0_12], %16 {strides = array<i32>} : memref<8x128xf32, #tpu.memory_space<vmem>>, vector<8x128xf32>,
    } else {
    }
    %c0_i32_3 = arith.constant 0 : i32
    %7 = arith.cmpi eq, %arg1, %c0_i32_3 : i32
    %8 = arith.extui %7 : i1 to i32
    %c0_i32_4 = arith.constant 0 : i32
    %9 = arith.cmpi ne, %8, %c0_i32_4 : i32
    scf.if %9 {
      %c0 = arith.constant 0 : index
      %c0_7 = arith.constant 0 : index
      %13 = vector.load %arg3[%c0, %c0_7] : memref<8x128xf32, #tpu.memory_space<vmem>>, vector<8x128xf32>
      %14 = tpu.iota {dimensions = array<i32: 1>} : vector<8x128xi32>
      %c8_i32 = arith.constant 8 : i32
      %15 = vector.broadcast %c8_i32 : i32 to vector<8x128xi32>
      %16 = arith.cmpi slt, %14, %15 : vector<8x128xi32>
      %cst_8 = arith.constant 0.000000e+00 : f32
      %17 = vector.broadcast %cst_8 : f32 to vector<8x128xf32>
      %18 = arith.select %16, %13, %17 : vector<8x128xi1>, vector<8x128xf32>
      %c0_9 = arith.constant 0 : index
      %c0_10 = arith.constant 0 : index
      %19 = vector.load %arg8[%c0_9, %c0_10] : memref<8x128xf32, #tpu.memory_space<vmem>>, vector<8x128xf32>
      %cst_11 = arith.constant dense<0.000000e+00> : vector<8x128xf32>
      %20 = tpu.matmul %18, %3, %cst_11 {dimension_numbers = #tpu.dot_dimension_numbers<[1], [0], [0], [1], [0, 0, 1, 1], [], []>} : vector<8x128xf32>, vector<128x128xf32>, vector<8x128xf32> -> vector<8x128xf32>
      %21 = arith.addf %19, %20 : vector<8x128xf32>
      %c0_12 = arith.constant 0 : index
      %c0_13 = arith.constant 0 : index
      %22 = vector.load %arg8[%c0_12, %c0_13] : memref<8x128xf32, #tpu.memory_space<vmem>>, vector<8x128xf32>
      tpu.vector_store %arg8[%c0_12, %c0_13], %21 {strides = array<i32>} : memref<8x128xf32, #tpu.memory_space<vmem>>, vector<8x128xf32>,
    } else {
    }
    %c0_i32_5 = arith.constant 0 : i32
    %10 = arith.cmpi eq, %arg1, %c0_i32_5 : i32
    %11 = arith.extui %10 : i1 to i32
    %c0_i32_6 = arith.constant 0 : i32
    %12 = arith.cmpi ne, %11, %c0_i32_6 : i32
    scf.if %12 {
      %c0 = arith.constant 0 : index
      %c0_7 = arith.constant 0 : index
      %13 = vector.load %arg8[%c0, %c0_7] : memref<8x128xf32, #tpu.memory_space<vmem>>, vector<8x1xf32>
      %cst_8 = arith.constant 1.000000e+00 : f32
      %14 = vector.broadcast %cst_8 : f32 to vector<8x1xf32>
      %15 = arith.addf %14, %13 : vector<8x1xf32>
      %c0_9 = arith.constant 0 : index
      %c0_10 = arith.constant 0 : index
      %16 = vector.load %arg4[%c0_9, %c0_10] : memref<8x1xf32, #tpu.memory_space<vmem>>, vector<8x1xf32>
      %cst_11 = arith.constant 1.000000e+00 : f32
      %17 = vector.broadcast %cst_11 : f32 to vector<8x1xf32>
      %18 = arith.addf %17, %16 : vector<8x1xf32>
      %19 = tpu.reciprocal %15 : vector<8x1xf32> -> vector<8x1xf32>
      %20 = arith.mulf %18, %19 : vector<8x1xf32>
      %c0_12 = arith.constant 0 : index
      %c0_13 = arith.constant 0 : index
      %21 = vector.load %arg9[%c0_12, %c0_13] : memref<8x128xf32, #tpu.memory_space<vmem>>, vector<8x128xf32>
      %22 = vector.broadcast %20 : vector<8x1xf32> to vector<8x128xf32>
      %23 = arith.mulf %22, %21 : vector<8x128xf32>
      %c0_14 = arith.constant 0 : index
      %c0_15 = arith.constant 0 : index
      %24 = vector.load %arg7[%c0_14, %c0_15] : memref<8x128xf32, #tpu.memory_space<vmem>>, vector<8x128xf32>
      tpu.vector_store %arg7[%c0_14, %c0_15], %23 {strides = array<i32>} : memref<8x128xf32, #tpu.memory_space<vmem>>, vector<8x128xf32>,
    } else {
    }
    return
  }
  func.func @transform_0(%arg0: i32, %arg1: i32) -> (i32, i32) {
    %c0_i32 = arith.constant 0 : i32
    %c0_i32_0 = arith.constant 0 : i32
    return %arg0, %c0_i32 : i32, i32
  }
  func.func @transform_1(%arg0: i32, %arg1: i32) -> (i32, i32) {
    %c0_i32 = arith.constant 0 : i32
    return %arg0, %arg1 : i32, i32
  }
  func.func @transform_2(%arg0: i32, %arg1: i32) -> (i32, i32) {
    %c0_i32 = arith.constant 0 : i32
    %c0_i32_0 = arith.constant 0 : i32
    return %arg0, %c0_i32 : i32, i32
  }
  func.func @transform_3(%arg0: i32, %arg1: i32) -> (i32, i32) {
    %c0_i32 = arith.constant 0 : i32
    %c0_i32_0 = arith.constant 0 : i32
    %c0_i32_1 = arith.constant 0 : i32
    return %c0_i32, %c0_i32_0 : i32, i32
  }
  func.func @transform_4(%arg0: i32, %arg1: i32) -> (i32, i32) {
    %c0_i32 = arith.constant 0 : i32
    %c0_i32_0 = arith.constant 0 : i32
    %c0_i32_1 = arith.constant 0 : i32
    return %c0_i32, %c0_i32_0 : i32, i32
  }
  func.func @transform_5(%arg0: i32, %arg1: i32) -> (i32, i32) {
    %c0_i32 = arith.constant 0 : i32
    %c0_i32_0 = arith.constant 0 : i32
    return %arg0, %c0_i32 : i32, i32
  }
}

</mosaic_0001>

<bundles_post_ra>
// kernel: tpu_custom_call.1
= control target key start
LH: loop header
LB: loop body
LE: loop exit
PB: predicated region body
PF: predicated region fallthrough
CT: control target
= control target key end

     0   :  { %10 = vsyncpa [#allocation5], 0  ;;  %s526_s0 = inlined_call_operand.vmem [shape: f32[8,16], index: 0, kind: input, shape index: {}]   ;;  %s527_s1 = inlined_call_operand.hbm [shape: f32[8,8], index: 1, kind: input, shape index: {}]   ;;  %s528_s2 = inlined_call_operand.vmem [shape: f32[8,1], index: 2, kind: input, shape index: {}]   ;;  %s529_s3 = inlined_call_operand.hbm [shape: f32[16,128], index: 3, kind: input, shape index: {}]   ;;  %s530_s4 = inlined_call_operand.vmem [shape: f32[1,128], index: 4, kind: input, shape index: {}]   ;;  %s531_s5 = inlined_call_operand.hbm [shape: f32[8,128], index: 5, kind: output, shape index: {}]  }
   0x1   :  { %11 = vsyncpa [#allocation8], 0 }
   0x2   :  { %12 = vsyncpa [#allocation6], 0  ;;  %s469_s18 = smov [#allocation4]   ;;  %s470_s20 = smov [#allocation7]  }
   0x3   :  { %s21_s19 = sshll.u32 %s469_s18, 4  ;;  %s32_s21 = sshll.u32 %s470_s20, 4  ;;  %s22_s19 = int_to_ptr.vmem [resolvable:$true] %s21_s19  ;;  %s33_s21 = int_to_ptr.vmem [resolvable:$true] %s32_s21 }
   0x4   :  { %s411_s22 = scalar_lea.vmem %s22_s19, 128  ;;  %p416_p1 = scmp.lt.s32.totalorder %s22_s19, %s22_s19 }
   0x5   :  { %p412_p0 = scmp.ne.s32.totalorder %s22_s19, %s411_s22  ;;  %p417_p2 = scmp.lt.s32.totalorder %s411_s22, %s411_s22 }
   0x7   :  { %p418_p3 = por %p417_p2, %p416_p1 }
   0x9   :  { %p419_p4 = pnand %p418_p3, %p412_p0 }
   0xb   :  { %422 = shalt.err (!%p419_p4)
}
   0xc   :  { %24 = dma.hbm_to_vmem [thread:$0]  %s527_s1, 128, %s22_s19, [#allocation5]  }
   0xd   :  { %s431_s25 = scalar_lea.vmem %s33_s21, 256  ;;  %p436_p6 = scmp.lt.s32.totalorder %s33_s21, %s33_s21 }
   0xe   :  { %p432_p5 = scmp.ne.s32.totalorder %s33_s21, %s431_s25  ;;  %p437_p7 = scmp.lt.s32.totalorder %s431_s25, %s431_s25 }
  0x10   :  { %p438_p8 = por %p437_p7, %p436_p6 }
  0x12   :  { %p439_p9 = pnand %p438_p8, %p432_p5 }
  0x14   :  { %442 = shalt.err (!%p439_p9)
}
  0x15   :  { %s471_s26 = smov 128   ;;  %s472_s27 = smov 8  }
  0x16   :  { %38 = dma.hbm_to_vmem [thread:$0]  %s529_s3, 256, %s33_s21, [#allocation8], %s471_s26, %s471_s26, %s472_s27  }
  0x17   :  { %463 = dma.done.wait [#allocation5], 128  }
  0x18   :  { %464 = vsyncadd [#allocation5], 4294967168 }
  0x19   :  { %465 = dma.done.wait [#allocation8], 256  }
  0x1a   :  { %466 = vsyncadd [#allocation8], 4294967040  ;;  %v473_v0 = vmov 0.0   ;;  %vm474_vm0 = vmmov 0   ;;  %v475_v1 = vmov 1.0   ;;  %v54_v2 = vld [vmem:[#allocation7 + $0x8] sm:$0xff]  ;;  %v219_v5 = vlaneseq }
  0x1b   :  { %356 = vmatprep.subr.mxu1 %v473_v0  ;;  %388 = vmatprep.mubr.msk.f32.mxu1 %vm474_vm0, %v473_v0  ;;  %v53_v3 = vld [vmem:[#allocation7] sm:$0xff]  ;;  %v52_v4 = vld [vmem:[%s526_s0] sm:$0xff]  ;;  %vm62_vm1 = vcmask 130048   ;;  %v476_v8 = vmov 0   ;;  %s477_s8 = smov [#allocation9]  }
  0x1c   :  { %357 = vmatpush3.msra.mxu1 %v475_v1  ;;  %349 = vmatprep.subr.mxu0 %v473_v0  ;;  %v220_v6 = vand.u32 127, %v219_v5  ;;  %v218_v7 = vld [vmem:[#allocation4] sm:$0xff]  ;;  %s316_s9 = sshll.u32 %s477_s8, 4  ;;  %s317_s9 = int_to_ptr.vmem [resolvable:$true] %s316_s9 }
  0x1d   :  { %358 = vmatprep.subr.mxu1 %v473_v0  ;;  %353 = vmatprep.mubr.msk.f32.mxu0 %vm474_vm0, %v473_v0  ;;  %v298_v14 = vld [vmem:[%s528_s2] sm:$0xff]  ;;  %s443_s10 = scalar_lea.vmem %s317_s9, 128  ;;  %p448_p11 = scmp.lt.s32.totalorder %s317_s9, %s317_s9 }
  0x1e   :  { %359 = vmatpush3.msra.mxu1 %v475_v1  ;;  %350 = vmatpush3.msra.mxu0 %v54_v2  ;;  %vm221_vm2 = vcmp.lt.s32.totalorder %v220_v6, 8  ;;  %v299_v15 = vadd.f32 1.0, %v298_v14  ;;  %v326_v18 = vld [vmem:[%s530_s4] ss:$0 sm:$0xff]  ;;  %p444_p10 = scmp.ne.s32.totalorder %s317_s9, %s443_s10  ;;  %p449_p12 = scmp.lt.s32.totalorder %s443_s10, %s443_s10 }
  0x1f   :  { %360 = vmatprep.subr.mxu1 %v473_v0  ;;  %351 = vmatprep.subr.mxu0 %v473_v0 }
  0x20   :  { %361 = vmatpush3.msra.mxu1 %v475_v1  ;;  %352 = vmatpush3.msra.mxu0 %v53_v3  ;;  %p450_p13 = por %p449_p12, %p448_p11 }
  0x21   :  { %362 = vmatprep.subr.mxu1 %v473_v0  ;;  %354 = vmatmul.mubr.msk.f32.vlgmr.msra.gmra.mxu0 %vm62_vm1, %v52_v4 }
  0x22   :  { %363 = vmatpush3.msra.mxu1 %v475_v1  ;;  %400 = vset.pattern.permute.xlu0 %v476_v8  ;;  %p451_p0 = pnand %p450_p13, %p444_p10 }
  0x23   :  { %364 = vmatprep.subr.mxu1 %v473_v0 }
  0x24   :  { %365 = vmatpush3.msra.mxu1 %v475_v1 }
  0x25   :  { %366 = vmatprep.subr.mxu1 %v473_v0 }
  0x26   :  { %367 = vmatpush3.msra.mxu1 %v475_v1 }
  0x27   :  { %368 = vmatprep.subr.mxu1 %v473_v0 }
  0x28   :  { %369 = vmatpush3.msra.mxu1 %v475_v1 }
  0x29   :  { %370 = vmatprep.subr.mxu1 %v473_v0 }
  0x2a   :  { %371 = vmatpush3.msra.mxu1 %v475_v1 }
  0x2b   :  { %372 = vmatprep.subr.mxu1 %v473_v0 }
  0x2c   :  { %373 = vmatpush3.msra.mxu1 %v475_v1 }
  0x2d   :  { %374 = vmatprep.subr.mxu1 %v473_v0 }
  0x2e   :  { %375 = vmatpush3.msra.mxu1 %v475_v1 }
  0x2f   :  { %376 = vmatprep.subr.mxu1 %v473_v0 }
  0x30   :  { %377 = vmatpush3.msra.mxu1 %v475_v1 }
  0x31   :  { %378 = vmatprep.subr.mxu1 %v473_v0 }
  0x32   :  { %379 = vmatpush3.msra.mxu1 %v475_v1 }
  0x33   :  { %380 = vmatprep.subr.mxu1 %v473_v0 }
  0x34   :  { %381 = vmatpush3.msra.mxu1 %v475_v1 }
  0x35   :  { %382 = vmatprep.subr.mxu1 %v473_v0 }
  0x36   :  { %383 = vmatpush3.msra.mxu1 %v475_v1 }
  0x37   :  { %384 = vmatprep.subr.mxu1 %v473_v0 }
  0x38   :  { %385 = vmatpush3.msra.mxu1 %v475_v1 }
  0x39   :  { %386 = vmatprep.subr.mxu1 %v473_v0 }
  0x3a   :  { %387 = vmatpush3.msra.mxu1 %v475_v1 }
  0x3b   :  { %389 = vmatmul.mubr.msk.f32.vlgmr.msra.gmra.mxu1 %vm221_vm2, %v218_v7 }
  0xe1   :  { %v132_v9 = vpop.f32.mrf.mxu0 }
  0xe2   :  { %v133_v19 = vadd.f32 %v326_v18, %v132_v9 }
  0xe3   :  { %v355_v10 = vpop.f32.mrf.mxu0 }
  0xfb   :  { %v290_v11 = vpop.f32.mrf.mxu1 }
  0xfc   :  { %v297_v12 = vadd.f32 1.0, %v290_v11 }
  0xfd   :  { %v390_v13 = vpop.f32.mrf.mxu1 }
  0xfe   :  { %401 = vrcp.f32 %v297_v12 }
 0x10b   :  { %v402_v16 = vpop.eup %401 }
 0x10c   :  { %v301_v17 = vmul.f32 %v402_v16, %v299_v15 }
 0x10e   :  { %305 = vperm.xlu0 %400, %v301_v17  }
 0x189   :  { %v306_v20 = vpop.permute.xlu0 %305 }
 0x18a   :  { %v308_v21 = vmul.f32 %v306_v20, %v133_v19 }
 0x18c   :  { %309 = vst [vmem:[#allocation9] sm:$0xff] %v308_v21 }
 0x18d   :  { %454 = shalt.err (!%p451_p0)
}
 0x18e   :  { %319 = dma.vmem_to_hbm [thread:$0]  %s317_s9, 128, %s531_s5, [#allocation6]  }
 0x18f   :  { %467 = dma.done.wait [#allocation6], 128  }
 0x190   :  { %468 = vsyncadd [#allocation6], 4294967168 }
 0x191   :  { %323 = vsyncpa [#allocation5], 1 }
 0x192   :  { %324 = vsyncpa [#allocation8], 1 }
 0x193   :  { %325 = vsyncpa [#allocation6], 1 }

</bundles_post_ra>
